<compile_context>
chip_gen: v7x
topology: tpu7x:2x2x1
jax: 0.10.0
libtpu: 0.0.40
codegen_flags: <defaults>
</compile_context>

<pallas_src>
import math

import jax
import jax.numpy as jnp
from jax import lax
from jax.experimental import pallas as pl
from jax.experimental.pallas import tpu as pltpu

# ---------------- Config (mirrors Config; synthetic small dims) -------------
STATE_SIZE = 32
FC1_DIM = 64
FC2_DIM = 64
MAX_ACTION = 2.0

LANES = 128          # TPU lane width
TILE_B_MAX = 1024    # max batch rows per grid step

assert FC1_DIM <= LANES
assert FC2_DIM < LANES   # lane FC2_DIM of h2 is reserved as the fc_mu bias lane


# ---------------- Pallas kernel ----------------
def actor_kernel(s_ref, w_ref, b_ref, o_ref):
    x = s_ref[...]                               # (tile_b, S)

    # Static, aligned sub-views of the full-tile slabs (no lane slicing).
    w1 = w_ref[0, 0:STATE_SIZE, :]               # (S, 128)   cols >= F1 are zero
    w2 = w_ref[1]                                # (128, 128) col FC2_DIM is zero
    wmu = w_ref[2, 0:1, :]                       # (1, 128)   lane FC2_DIM = bmu
    b1 = b_ref[0:1, :]                           # (1, 128)
    b2 = b_ref[1:2, :]                           # (1, 128)   lane FC2_DIM = 1.0

    # fc1 + relu (padding lanes stay exactly 0)
    h1 = jnp.maximum(
        jnp.dot(x, w1, preferred_element_type=jnp.float32) + b1, 0.0)
    # fc2 + relu; lane FC2_DIM becomes relu(0 + 1) == 1 and carries the fc_mu bias
    h2 = jnp.maximum(
        jnp.dot(h1, w2, preferred_element_type=jnp.float32) + b2, 0.0)
    # fc_mu: contract both operands on their lane axis (q @ k^T pattern) so the
    # result is a lane-dense (1, tile_b) row; bmu rides on the bias lane.
    mu = lax.dot_general(wmu, h2, (((1,), (1,)), ((), ())),
                         preferred_element_type=jnp.float32)    # (1, tile_b)
    row = MAX_ACTION * jnp.tanh(mu)
    o_ref[...] = row.reshape(o_ref.shape).astype(o_ref.dtype)


# ---------------- Parameter packing ----------------
def pack_params(params):
    """Pack 6 tiny parameter tensors into 2 full-(8,128)-tile slabs."""
    w1, b1, w2, b2, wmu, bmu = params
    w_slab = jnp.zeros((3, LANES, LANES), jnp.float32)
    w_slab = w_slab.at[0, :STATE_SIZE, :FC1_DIM].set(w1)
    w_slab = w_slab.at[1, :FC1_DIM, :FC2_DIM].set(w2)
    w_slab = w_slab.at[2, 0, :FC2_DIM].set(wmu[:, 0])
    w_slab = w_slab.at[2, 0, FC2_DIM].set(bmu[0, 0])       # fc_mu bias lane

    b_slab = jnp.zeros((2, LANES), jnp.float32)
    b_slab = b_slab.at[0, :FC1_DIM].set(b1[0])
    b_slab = b_slab.at[1, :FC2_DIM].set(b2[0])
    b_slab = b_slab.at[1, FC2_DIM].set(1.0)                # h2[:, FC2_DIM] == 1
    return w_slab, b_slab


# ---------------- Wrapper ----------------
def _choose_tile_b(batch):
    # Big tiles amortize per-step overhead; cap near ceil(B/2) so v7x's two
    # TensorCores both get grid steps; multiples of 128 keep the output row
    # lane-dense (unmasked vst).
    half = ((batch + 1) // 2 + LANES - 1) // LANES * LANES
    return int(max(LANES, min(TILE_B_MAX, half)))


def actor_forward(state, packed_params, *, tile_b=None):
    """state: (B, STATE_SIZE) f32.  Returns (B, 1) f32."""
    w_slab, b_slab = packed_params
    state = state.astype(jnp.float32)
    B = state.shape[0]
    if tile_b is None:
        tile_b = _choose_tile_b(B)
    assert tile_b % LANES == 0
    nb = pl.cdiv(B, tile_b)

    out_rows = pl.pallas_call(
        actor_kernel,
        out_shape=jax.ShapeDtypeStruct((nb, 1, tile_b), jnp.float32),
        grid=(nb,),
        in_specs=[
            # state: tiled over batch; ragged last block is clipped by Pallas
            pl.BlockSpec((tile_b, STATE_SIZE), lambda i: (i, 0)),
            # weight / bias slabs: constant index_map -> VMEM-resident
            pl.BlockSpec((3, LANES, LANES), lambda i: (0, 0, 0)),
            pl.BlockSpec((2, LANES), lambda i: (0, 0)),
        ],
        out_specs=pl.BlockSpec((1, 1, tile_b), lambda i: (i, 0, 0)),
        compiler_params=pltpu.CompilerParams(
            dimension_semantics=("parallel",)),
    )(state, w_slab, b_slab)

    # (nb, 1, tile_b) lane-dense rows -> (nb*tile_b, 1); rows >= B are
    # edge-block garbage (tiny slice, a few KB at most).
    return out_rows.reshape(nb * tile_b, 1)[:B]


# ---------------- Parameter init (mirrors init_ff_layer) ----------------
def init_linear(key, in_dim, out_dim, f1=None):
    """PyTorch: weight (out,in), bias (out,), both U(-f1, f1) with
    f1 = 1/sqrt(out) by default.  We store weight transposed as (in, out)."""
    if f1 is None:
        f1 = 1.0 / math.sqrt(out_dim)
    kw, kb = jax.random.split(key)
    w = jax.random.uniform(kw, (in_dim, out_dim), jnp.float32, -f1, f1)
    b = jax.random.uniform(kb, (1, out_dim), jnp.float32, -f1, f1)
    return w, b


def make_params(key):
    k1, k2, k3 = jax.random.split(key, 3)
    w1, b1 = init_linear(k1, STATE_SIZE, FC1_DIM)
    w2, b2 = init_linear(k2, FC1_DIM, FC2_DIM)
    wmu, bmu = init_linear(k3, FC2_DIM, 1)
    return (w1, b1, w2, b2, wmu, bmu)


# ---------------- Reference (plain JAX) ----------------
def actor_forward_ref(state, params):
    w1, b1, w2, b2, wmu, bmu = params
    x = jnp.maximum(state @ w1 + b1, 0.0)
    x = jnp.maximum(x @ w2 + b2, 0.0)
    return MAX_ACTION * jnp.tanh(x @ wmu + bmu)


if __name__ == "__main__":
    key = jax.random.PRNGKey(0)
    kp, ks1, ks2 = jax.random.split(key, 3)
    params = make_params(kp)
    packed = pack_params(params)

    # Medium batch: tile chooser picks 128-row tiles -> grid=(2,), both grid
    # steps independent ("parallel", feeds both TCs on v7x).
    state = jax.random.normal(ks1, (256, STATE_SIZE), jnp.float32)
    out = jax.block_until_ready(actor_forward(state, packed))
    ref = actor_forward_ref(state, params)
    assert out.shape == (256, 1), out.shape
    assert jnp.allclose(out, ref, atol=1e-5, rtol=1e-5)

    # Small ragged batch: single clipped edge block, no host-side pad; garbage
    # rows land in lanes >= B and are sliced away.
    state_small = jax.random.normal(ks2, (5, STATE_SIZE), jnp.float32)
    out_small = jax.block_until_ready(actor_forward(state_small, packed))
    ref_small = actor_forward_ref(state_small, params)
    assert out_small.shape == (5, 1), out_small.shape
    assert jnp.allclose(out_small, ref_small, atol=1e-5, rtol=1e-5)

    print("KERNEL_OK")
</pallas_src>

<mosaic_0001>
module attributes {stable_mosaic.version = 11 : i64} {
  func.func @actor_kernel(%arg0: i32, %arg1: memref<128x32xf32, #tpu.memory_space<vmem>>, %arg2: memref<3x128x128xf32, #tpu.memory_space<vmem>>, %arg3: memref<2x128xf32, #tpu.memory_space<vmem>>, %arg4: memref<1x1x128xf32, #tpu.memory_space<vmem>>) attributes {dimension_semantics = [#tpu.dimension_semantics<parallel>], iteration_bounds = array<i64: 2>, scalar_prefetch = 0 : i64, scratch_operands = 0 : i64, tpu.core_type = #tpu.core_type<tc>, window_params = [{transform_indices = @transform_0, window_bounds = array<i64: 128, 32>}, {pipeline_mode = #tpu.pipeline_mode<synchronous>, transform_indices = @transform_1, window_bounds = array<i64: 3, 128, 128>}, {pipeline_mode = #tpu.pipeline_mode<synchronous>, transform_indices = @transform_2, window_bounds = array<i64: 2, 128>}, {transform_indices = @transform_3, window_bounds = array<i64: 1, 1, 128>}]} {
    %c0 = arith.constant 0 : index
    %c0_0 = arith.constant 0 : index
    %0 = vector.load %arg1[%c0, %c0_0] : memref<128x32xf32, #tpu.memory_space<vmem>>, vector<128x32xf32>
    %c0_1 = arith.constant 0 : index
    %c0_2 = arith.constant 0 : index
    %c0_3 = arith.constant 0 : index
    %1 = vector.load %arg2[%c0_1, %c0_2, %c0_3] : memref<3x128x128xf32, #tpu.memory_space<vmem>>, vector<1x32x128xf32>
    %2 = vector.shape_cast %1 : vector<1x32x128xf32> to vector<32x128xf32>
    %c1 = arith.constant 1 : index
    %c0_4 = arith.constant 0 : index
    %c0_5 = arith.constant 0 : index
    %3 = vector.load %arg2[%c1, %c0_4, %c0_5] : memref<3x128x128xf32, #tpu.memory_space<vmem>>, vector<1x128x128xf32>
    %4 = vector.shape_cast %3 : vector<1x128x128xf32> to vector<128x128xf32>
    %c2 = arith.constant 2 : index
    %c0_6 = arith.constant 0 : index
    %c0_7 = arith.constant 0 : index
    %5 = vector.load %arg2[%c2, %c0_6, %c0_7] : memref<3x128x128xf32, #tpu.memory_space<vmem>>, vector<1x1x128xf32>
    %6 = vector.shape_cast %5 : vector<1x1x128xf32> to vector<1x128xf32>
    %c0_8 = arith.constant 0 : index
    %c0_9 = arith.constant 0 : index
    %7 = vector.load %arg3[%c0_8, %c0_9] : memref<2x128xf32, #tpu.memory_space<vmem>>, vector<1x128xf32>
    %c1_10 = arith.constant 1 : index
    %c0_11 = arith.constant 0 : index
    %8 = vector.load %arg3[%c1_10, %c0_11] : memref<2x128xf32, #tpu.memory_space<vmem>>, vector<1x128xf32>
    %cst = arith.constant dense<0.000000e+00> : vector<128x128xf32>
    %9 = tpu.matmul %0, %2, %cst {dimension_numbers = #tpu.dot_dimension_numbers<[1], [0], [0], [1], [0, 0, 1, 1], [], []>} : vector<128x32xf32>, vector<32x128xf32>, vector<128x128xf32> -> vector<128x128xf32>
    %10 = vector.broadcast %7 : vector<1x128xf32> to vector<128x128xf32>
    %11 = arith.addf %9, %10 : vector<128x128xf32>
    %cst_12 = arith.constant 0.000000e+00 : f32
    %12 = vector.broadcast %cst_12 : f32 to vector<128x128xf32>
    %13 = arith.maximumf %11, %12 : vector<128x128xf32>
    %cst_13 = arith.constant dense<0.000000e+00> : vector<128x128xf32>
    %14 = tpu.matmul %13, %4, %cst_13 {dimension_numbers = #tpu.dot_dimension_numbers<[1], [0], [0], [1], [0, 0, 1, 1], [], []>} : vector<128x128xf32>, vector<128x128xf32>, vector<128x128xf32> -> vector<128x128xf32>
    %15 = vector.broadcast %8 : vector<1x128xf32> to vector<128x128xf32>
    %16 = arith.addf %14, %15 : vector<128x128xf32>
    %cst_14 = arith.constant 0.000000e+00 : f32
    %17 = vector.broadcast %cst_14 : f32 to vector<128x128xf32>
    %18 = arith.maximumf %16, %17 : vector<128x128xf32>
    %cst_15 = arith.constant dense<0.000000e+00> : vector<1x128xf32>
    %19 = tpu.matmul %6, %18, %cst_15 {dimension_numbers = #tpu.dot_dimension_numbers<[1], [1], [0], [0], [0, 0, 1, 0], [], []>} : vector<1x128xf32>, vector<128x128xf32>, vector<1x128xf32> -> vector<1x128xf32>
    %20 = math.tanh %19 : vector<1x128xf32>
    %cst_16 = arith.constant 2.000000e+00 : f32
    %21 = vector.broadcast %cst_16 : f32 to vector<1x128xf32>
    %22 = arith.mulf %21, %20 : vector<1x128xf32>
    %23 = vector.shape_cast %22 : vector<1x128xf32> to vector<1x1x128xf32>
    %c0_17 = arith.constant 0 : index
    %c0_18 = arith.constant 0 : index
    %c0_19 = arith.constant 0 : index
    %24 = vector.load %arg4[%c0_17, %c0_18, %c0_19] : memref<1x1x128xf32, #tpu.memory_space<vmem>>, vector<1x1x128xf32>
    tpu.vector_store %arg4[%c0_17, %c0_18, %c0_19], %23 {strides = array<i32>} : memref<1x1x128xf32, #tpu.memory_space<vmem>>, vector<1x1x128xf32>,
    return
  }
  func.func @transform_0(%arg0: i32) -> (i32, i32) {
    %c0_i32 = arith.constant 0 : i32
    %c0_i32_0 = arith.constant 0 : i32
    return %arg0, %c0_i32 : i32, i32
  }
  func.func @transform_1(%arg0: i32) -> (i32, i32, i32) {
    %c0_i32 = arith.constant 0 : i32
    %c0_i32_0 = arith.constant 0 : i32
    %c0_i32_1 = arith.constant 0 : i32
    %c0_i32_2 = arith.constant 0 : i32
    return %c0_i32, %c0_i32_0, %c0_i32_1 : i32, i32, i32
  }
  func.func @transform_2(%arg0: i32) -> (i32, i32) {
    %c0_i32 = arith.constant 0 : i32
    %c0_i32_0 = arith.constant 0 : i32
    %c0_i32_1 = arith.constant 0 : i32
    return %c0_i32, %c0_i32_0 : i32, i32
  }
  func.func @transform_3(%arg0: i32) -> (i32, i32, i32) {
    %c0_i32 = arith.constant 0 : i32
    %c0_i32_0 = arith.constant 0 : i32
    %c0_i32_1 = arith.constant 0 : i32
    return %arg0, %c0_i32, %c0_i32_0 : i32, i32, i32
  }
}

</mosaic_0001>

<bundles_post_ra>
// kernel: tpu_custom_call.1
= control target key start
LH: loop header
LB: loop body
LE: loop exit
PB: predicated region body
PF: predicated region fallthrough
CT: control target
= control target key end

     0   :  { %8 = vsyncpa [#allocation3], 0  ;;  %s1409_s0 = inlined_call_operand.vmem [shape: f32[256,32], index: 0, kind: input, shape index: {}]   ;;  %s1410_s1 = inlined_call_operand.hbm [shape: f32[3,128,128], index: 1, kind: input, shape index: {}]   ;;  %s1411_s2 = inlined_call_operand.vmem [shape: f32[2,128], index: 2, kind: input, shape index: {}]   ;;  %s1412_s3 = inlined_call_operand.hbm [shape: f32[2,1,128], index: 3, kind: output, shape index: {}]  }
   0x1   :  { %9 = vsyncpa [#allocation4], 0 }
   0x2   :  { %11 = vsyncpa [#allocation4 + $0x1], 0  ;;  %s1223_s12 = smov 0   ;;  %s1225_s13 = smov 0  }
   0x3   :  { %s1227_s14 = smov 0   ;;  %s1229_s15 = smov 0  }
   0x4 LB: > { %s1244_s16 = sadd.s32 4294967295, %s1194_s15   ;;  %s758_s17 = sadd.s32 4294967294, %s1194_s15   ;;  %s1194_s15 = sphi %s1229_s15, %s1428_s15   ;;  %s1190_s14 = sphi %s1227_s14, %s1427_s14   ;;  %s1186_s13 = sphi %s1225_s13, %s1426_s13   ;;  %s1182_s12 = sphi %s1223_s12, %s1425_s12  }
   0x5   : > { %s1248_s18 = sadd.s32 1, %s1194_s15   ;;  %s92_s19 = sadd.s32 1, %s1190_s14 }
   0x6   : > { %s89_s20 = ssub.s32 %s1194_s15, %s1248_s18  ;;  %p102_p0 = scmp.ne.s32.totalorder %s1190_s14, %s1186_s13 }
   0x7   : > { %p90_p1 = scmp.eq.s32.totalorder %s89_s20, 0  ;;  %p103_p2 = scmp.eq.s32.totalorder %s1244_s16, 1 }
   0x8   : > { %p108_p3 = scmp.ne.s32.totalorder %s1186_s13, %s1182_s12  ;;  %p109_p4 = scmp.eq.s32.totalorder %s758_s17, 1 }
   0x9   : > { %s1259_s21 = scalar_select %p90_p1, %s1190_s14, %s92_s19  }
   0xa   : > { %p1261_p5 = por %p103_p2, %p102_p0  ;;  %p1265_p6 = por %p109_p4, %p108_p3 }
   0xb   : > { %p759_p7 = scmp.ge.s32.totalorder %s1194_s15, 1  ;;  %p116_p8 = scmp.lt.s32.totalorder %s1194_s15, 3 }
   0xc   : > { %s1416_s22 = scalar_select %p1261_p5, 1, 0 }
   0xd   : > { %s1417_s23 = scalar_select %p1265_p6, 1, 0 }
   0xe   : > { %p1413_p9 = scmp.eq.s32.totalorder %s1244_s16, 0  ;;  %p1272_p10 = pnand %p759_p7, %p116_p8 }
   0xf   : > { %s1196_s25 = smov [#allocation2]   ;;  %s1100_s30 = scalar_lea.hbm %s1410_s1, 6144 }
  0x10   : > { %s1418_s24 = scalar_select %p1272_p10, 1, 0 }
  0x11   : > { %s128_s26 = sshll.u32 %s1196_s25, 4  ;;  %p1049_p11 = pneg %p1272_p10  ;;  %s129_s26 = int_to_ptr.vmem [resolvable:$true] %s128_s26 }
  0x12   : > { %p1101_p13 = scmp.ne.s32.totalorder %s1410_s1, %s1100_s30  ;;  %p1107_p3 = scmp.lt.u32.totalorder %s1100_s30, %s1410_s1 }
  0x13   : > { %p1280_p12 = pnand %p1413_p9, %p1049_p11 }
  0x15   : > { %p1102_p0 = pneg %p1280_p12 }
  0x17   : > { %p1103_p1 = pnand %p1102_p0, %p1101_p13 }
  0x19   : > { %p1104_p2 = pneg %p1103_p1 }
  0x1b   : > { %p1109_p4 = pnand %p1107_p3, %p1104_p2 }
  0x1d   : > { %1112 = shalt.err (!%p1109_p4)
}
  0x1e   : > { %s1113_s8 = scalar_lea.vmem %s129_s26, 6144  ;;  %p1121_p9 = scmp.lt.s32.totalorder %s129_s26, %s129_s26 }
  0x1f   : > { %p1114_p7 = scmp.ne.s32.totalorder %s129_s26, %s1113_s8  ;;  %p1122_p6 = scmp.lt.s32.totalorder %s1113_s8, %s1113_s8 }
  0x21   : > { %p1116_p8 = pnand %p1114_p7, %p1102_p0  ;;  %p1123_p5 = por %p1122_p6, %p1121_p9 }
  0x23   : > { %p1117_p11 = pneg %p1116_p8 }
  0x25   : > { %p1124_p10 = pnand %p1123_p5, %p1117_p11 }
  0x27   : > { %1127 = shalt.err (!%p1124_p10)
}
  0x28   : > { %s1197_s9 = smov 128   ;;  %s1198_s10 = smov 8  }
  0x29   : > { %1052 = dma.hbm_to_vmem [thread:$0]  (!%p1280_p12), %s1410_s1, 6144, %s129_s26, [#allocation3], %s1197_s9, %s1197_s9, %s1198_s10  }
  0x2a   : > { %p1420_p13 = scmp.ne.s32.totalorder %s1418_s24, 0 }
  0x2b   : > { %p1421_p1 = scmp.eq.s32.totalorder (!%p1420_p13), %s1244_s16, 0 }
  0x2c   : > { %156 = sbr.rel (%p1420_p13) target bundleno = 802 (0x322), region = 32 }
  0x33   : > { %1173 = dma.done.wait (%p1421_p1), [#allocation3], 6144   ;;  %p1422_p0 = pmov %p1421_p1 }
  0x34   : > { %s1307_s19 = sshll.u32 %s1244_s16, 4  ;;  %vm230_vm0 = vcmask 261120   ;;  %v201_v0 = vld [vmem:[#allocation2] sm:$0xff]  ;;  %v202_v1 = vld [vmem:[#allocation2 + $0x8] sm:$0xff]  ;;  %v203_v2 = vld [vmem:[#allocation2 + $0x10] sm:$0xff]  ;;  %vm1200_vm1 = vmmov 0  }
  0x35   : > { %1175 = vsyncadd (%p1422_p0), [#allocation3], 4294961152  ;;  %p180_p5 = scmp.lt.s32.totalorder %s1307_s19, 31  ;;  %v979_v3 = vpack.c.bf16 %v202_v1, %v201_v0  ;;  %v204_v4 = vld [vmem:[#allocation2 + $0x18] sm:$0xff]  ;;  %v206_v7 = vld [vmem:[#allocation2 + $0x80] sm:$0xff]  ;;  %s177_s4 = sand.u32 1, %s1186_s13  }
  0x36   : > { %v983_v6 = vpack.c.bf16 %v204_v4, %v203_v2  ;;  %v207_v8 = vld [vmem:[#allocation2 + $0x88] sm:$0xff]  ;;  %v208_v9 = vld [vmem:[#allocation2 + $0x90] sm:$0xff]  ;;  %v209_v10 = vld [vmem:[#allocation2 + $0x98] sm:$0xff]  ;;  %s178_s5 = scalar_lea.vmem [#allocation5], %s177_s4  ;;  %s1367_s9 = scalar_lea.hbm %s1412_s3, %s1307_s19 }
  0x37   : > { %s181_s20 = scalar_select %p180_p5, %s1307_s19, 31  ;;  %980 = vmatprep.subr.bf16.mxu1 %v979_v3  ;;  %v987_v12 = vpack.c.bf16 %v207_v8, %v206_v7  ;;  %v991_v14 = vpack.c.bf16 %v209_v10, %v208_v9  ;;  %v210_v15 = vld [vmem:[#allocation2 + $0xa0] sm:$0xff]  ;;  %v211_v16 = vld [vmem:[#allocation2 + $0xa8] sm:$0xff]  ;;  %v212_v20 = vld [vmem:[#allocation2 + $0xb0] sm:$0xff] }
  0x38   : > { %982 = vmatpush3.bf16.msra.mxu1 %v979_v3  ;;  %v995_v19 = vpack.c.bf16 %v211_v16, %v210_v15  ;;  %v213_v21 = vld [vmem:[#allocation2 + $0xb8] sm:$0xff]  ;;  %v214_v25 = vld [vmem:[#allocation2 + $0xc0] sm:$0xff]  ;;  %v215_v26 = vld [vmem:[#allocation2 + $0xc8] sm:$0xff]  ;;  %s691_s6 = sshll.u32 %s178_s5, 4  ;;  %s679_s10 = scalar_lea.sflag [#allocation4], %s177_s4  ;;  %s1369_s6 = int_to_ptr.vmem [resolvable:$true] %s691_s6 }
  0x39   : > { %s765_s25 = sshll.u32 %s181_s20, 3  ;;  %984 = vmatprep.subr.bf16.mxu1 %v983_v6  ;;  %v999_v24 = vpack.c.bf16 %v213_v21, %v212_v20  ;;  %v1003_v29 = vpack.c.bf16 %v215_v26, %v214_v25  ;;  %v216_v30 = vld [vmem:[#allocation2 + $0xd0] sm:$0xff]  ;;  %v217_v31 = vld [vmem:[#allocation2 + $0xd8] sm:$0xff]  ;;  %v218_v35 = vld [vmem:[#allocation2 + $0xe0] sm:$0xff]  ;;  %s1128_s11 = scalar_lea.vmem %s1369_s6, 16 }
  0x3a   : > { %s1314_s26 = scalar_lea.vmem %s1409_s0, %s765_s25  ;;  %v1007_v34 = vpack.c.bf16 %v217_v31, %v216_v30  ;;  %v219_v36 = vld [vmem:[#allocation2 + $0xe8] sm:$0xff]  ;;  %v220_v43 = vld [vmem:[#allocation2 + $0xf0] sm:$0xff]  ;;  %v221_v44 = vld [vmem:[#allocation2 + $0xf8] sm:$0xff]  ;;  %v1199_v31 = vmov 0.0|0.0   ;;  %p1129_p6 = scmp.ne.s32.totalorder %s1369_s6, %s1128_s11 }
  0x3b   : > { %v185_v5 = vld [vmem:[%s1314_s26] sm:$0xff]  ;;  %v186_v11 = vld [vmem:[%s1314_s26 + $0x8] sm:$0xff]  ;;  %v187_v13 = vld [vmem:[%s1314_s26 + $0x10] sm:$0xff]  ;;  %v1011_v39 = vpack.c.bf16 %v219_v36, %v218_v35  ;;  %v1015_v45 = vpack.c.bf16 %v221_v44, %v220_v43  ;;  %1019 = vmatprep.subr.bf16.mxu0 %v1199_v31  ;;  %p1423_p9 = scmp.ne.s32.totalorder %s1416_s22, 0  ;;  %s1202_s17 = smov [#allocation5]  }
  0x3c   : > { %864 = vmatprep.mubr.msk.f32.mxu1 %vm230_vm0, %v185_v5  ;;  %986 = vmatpush3.bf16.msra.mxu1 %v983_v6  ;;  %v188_v17 = vld [vmem:[%s1314_s26 + $0x18] sm:$0xff]  ;;  %v189_v18 = vld [vmem:[%s1314_s26 + $0x20] sm:$0xff]  ;;  %v190_v22 = vld [vmem:[%s1314_s26 + $0x28] sm:$0xff]  ;;  %s1132_s20 = sshll.u32 %s1202_s17, 4  ;;  %s1133_s20 = int_to_ptr.vmem [resolvable:$false] %s1132_s20 }
  0x3d   : > { %988 = vmatprep.subr.bf16.mxu1 %v987_v12  ;;  %v191_v23 = vld [vmem:[%s1314_s26 + $0x30] sm:$0xff]  ;;  %v192_v27 = vld [vmem:[%s1314_s26 + $0x38] sm:$0xff]  ;;  %v193_v28 = vld [vmem:[%s1314_s26 + $0x40] sm:$0xff]  ;;  %p1130_p10 = pnand %p1129_p6, %p1423_p9  ;;  %s1134_s25 = scalar_lea.vmem %s1133_s20, 32 }
  0x3e   : > { %v194_v32 = vld [vmem:[%s1314_s26 + $0x48] sm:$0xff]  ;;  %v195_v33 = vld [vmem:[%s1314_s26 + $0x50] sm:$0xff]  ;;  %v196_v37 = vld [vmem:[%s1314_s26 + $0x58] sm:$0xff]  ;;  %p1135_p2 = scmp.lt.s32.totalorder %s1369_s6, %s1133_s20  ;;  %p1136_p3 = scmp.lt.s32.totalorder %s1134_s25, %s1128_s11 }
  0x3f   : > { %865 = vmatmul.mubr.msk.f32.vlgmr.msra.gmra.mrb[0].mxu1 %vm230_vm0, %v186_v11  ;;  %v197_v38 = vld [vmem:[%s1314_s26 + $0x60] sm:$0xff]  ;;  %v198_v40 = vld [vmem:[%s1314_s26 + $0x68] sm:$0xff]  ;;  %v199_v41 = vld [vmem:[%s1314_s26 + $0x70] sm:$0xff]  ;;  %p1131_p12 = pneg %p1130_p10 }
  0x40   : > { %867 = vmatprep.mubr.msk.f32.mxu1 %vm230_vm0, %v187_v13  ;;  %990 = vmatpush3.bf16.msra.mxu1 %v987_v12  ;;  %v200_v42 = vld [vmem:[%s1314_s26 + $0x78] sm:$0xff]  ;;  %v766_v46 = vld [vmem:[%s1411_s2] ss:$0 sm:$0xff]  ;;  %p1137_p4 = por %p1136_p3, %p1135_p2 }
  0x41   : > { %992 = vmatprep.subr.bf16.mxu1 %v991_v14 }
  0x42   : > { %p1138_p7 = pnand %p1137_p4, %p1131_p12 }
  0x43   : > { %868 = vmatmul.mubr.msk.f32.gmra.mrb[2].mxu1 %vm230_vm0, %v188_v17 }
  0x44   : > { %870 = vmatprep.mubr.msk.f32.mxu1 %vm230_vm0, %v189_v18  ;;  %994 = vmatpush3.bf16.msra.mxu1 %v991_v14 }
  0x45   : > { %996 = vmatprep.subr.bf16.mxu1 %v995_v19 }
  0x47   : > { %871 = vmatmul.mubr.msk.f32.gmra.mrb[4].mxu1 %vm230_vm0, %v190_v22 }
  0x48   : > { %873 = vmatprep.mubr.msk.f32.mxu1 %vm230_vm0, %v191_v23  ;;  %998 = vmatpush3.bf16.msra.mxu1 %v995_v19 }
  0x49   : > { %1000 = vmatprep.subr.bf16.mxu1 %v999_v24 }
  0x4b   : > { %874 = vmatmul.mubr.msk.f32.gmra.mrb[6].mxu1 %vm230_vm0, %v192_v27 }
  0x4c   : > { %876 = vmatprep.mubr.msk.f32.mxu1 %vm230_vm0, %v193_v28  ;;  %1002 = vmatpush3.bf16.msra.mxu1 %v999_v24 }
  0x4d   : > { %1004 = vmatprep.subr.bf16.mxu1 %v1003_v29 }
  0x4f   : > { %877 = vmatmul.mubr.msk.f32.gmra.mrb[8].mxu1 %vm230_vm0, %v194_v32  ;;  %v1201_v32 = vmov 0.0  }
  0x50   : > { %879 = vmatprep.mubr.msk.f32.mxu1 %vm230_vm0, %v195_v33  ;;  %1006 = vmatpush3.bf16.msra.mxu1 %v1003_v29  ;;  %v783_v33 = vld [vmem:[%s1411_s2 + $0x1] ss:$0 sm:$0xff] }
  0x51   : > { %1008 = vmatprep.subr.bf16.mxu1 %v1007_v34  ;;  %976 = vmatprep.mubr.msk.f32.mxu0 %vm1200_vm1, %v1201_v32 }
  0x53   : > { %880 = vmatmul.mubr.msk.f32.gmra.mrb[10].mxu1 %vm230_vm0, %v196_v37 }
  0x54   : > { %882 = vmatprep.mubr.msk.f32.mxu1 %vm230_vm0, %v197_v38  ;;  %1010 = vmatpush3.bf16.msra.mxu1 %v1007_v34 }
  0x55   : > { %1012 = vmatprep.subr.bf16.mxu1 %v1011_v39 }
  0x57   : > { %883 = vmatmul.mubr.msk.f32.gmra.mrb[12].mxu1 %vm230_vm0, %v198_v40 }
  0x58   : > { %885 = vmatprep.mubr.msk.f32.mxu1 %vm230_vm0, %v199_v41  ;;  %1014 = vmatpush3.bf16.msra.mxu1 %v1011_v39 }
  0x59   : > { %1016 = vmatprep.subr.bf16.mxu1 %v1015_v45 }
  0x5b   : > { %886 = vmatmul.mubr.msk.f32.gmra.mrb[14].mxu1 %vm230_vm0, %v200_v42 }
  0x5c   : > { %1018 = vmatpush3.bf16.msra.mxu1 %v1015_v45 }
 0x112   : > { %v866_v47 = vpop.f32.mrb[0].mxu1 }
 0x113   : > { %v351_v48 = vadd.f32 %v866_v47, %v766_v46  ;;  %v345_v49 = vpop.f32.mrb[1].mxu1 }
 0x114   : > { %v346_v50 = vadd.f32 %v766_v46, %v345_v49 }
 0x115   : > { %v425_v53 = vmax.f32 %v351_v48, 0.0 }
 0x116   : > { %v424_v51 = vmax.f32 %v346_v50, 0.0  ;;  %v869_v52 = vpop.f32.mrb[2].mxu1 }
 0x117   : > { %v361_v54 = vadd.f32 %v869_v52, %v766_v46  ;;  %v355_v55 = vpop.f32.mrb[3].mxu1 }
 0x118   : > { %v356_v56 = vadd.f32 %v766_v46, %v355_v55  ;;  %920 = vmatprep.mubr.f32.mxu1 %v424_v51 }
 0x119   : > { %v427_v57 = vmax.f32 %v361_v54, 0.0  ;;  %921 = vmatmul.mubr.f32.vlgmr.msra.gmra.mrb[16].mxu1 %v425_v53 }
 0x11a   : > { %v426_v58 = vmax.f32 %v356_v56, 0.0  ;;  %v872_v59 = vpop.f32.mrb[4].mxu1 }
 0x11b   : > { %v371_v60 = vadd.f32 %v872_v59, %v766_v46  ;;  %v365_v61 = vpop.f32.mrb[5].mxu1 }
 0x11c   : > { %923 = vmatprep.mubr.f32.mxu1 %v426_v58  ;;  %v366_v62 = vadd.f32 %v766_v46, %v365_v61 }
 0x11d   : > { %924 = vmatmul.mubr.f32.gmra.mrb[18].mxu1 %v427_v57  ;;  %v429_v63 = vmax.f32 %v371_v60, 0.0 }
 0x11e   : > { %v428_v0 = vmax.f32 %v366_v62, 0.0  ;;  %v875_v1 = vpop.f32.mrb[6].mxu1 }
 0x11f   : > { %v381_v2 = vadd.f32 %v875_v1, %v766_v46  ;;  %v375_v3 = vpop.f32.mrb[7].mxu1 }
 0x120   : > { %926 = vmatprep.mubr.f32.mxu1 %v428_v0  ;;  %v376_v4 = vadd.f32 %v766_v46, %v375_v3 }
 0x121   : > { %927 = vmatmul.mubr.f32.gmra.mrb[20].mxu1 %v429_v63  ;;  %v431_v5 = vmax.f32 %v381_v2, 0.0 }
 0x122   : > { %v430_v6 = vmax.f32 %v376_v4, 0.0  ;;  %v878_v7 = vpop.f32.mrb[8].mxu1 }
 0x123   : > { %v391_v8 = vadd.f32 %v878_v7, %v766_v46  ;;  %v385_v9 = vpop.f32.mrb[9].mxu1 }
 0x124   : > { %929 = vmatprep.mubr.f32.mxu1 %v430_v6  ;;  %v386_v10 = vadd.f32 %v766_v46, %v385_v9 }
 0x125   : > { %930 = vmatmul.mubr.f32.gmra.mrb[22].mxu1 %v431_v5  ;;  %v433_v11 = vmax.f32 %v391_v8, 0.0 }
 0x126   : > { %v432_v12 = vmax.f32 %v386_v10, 0.0  ;;  %v881_v13 = vpop.f32.mrb[10].mxu1 }
 0x127   : > { %v401_v14 = vadd.f32 %v881_v13, %v766_v46  ;;  %v395_v15 = vpop.f32.mrb[11].mxu1 }
 0x128   : > { %932 = vmatprep.mubr.f32.mxu1 %v432_v12  ;;  %v396_v16 = vadd.f32 %v766_v46, %v395_v15 }
 0x129   : > { %933 = vmatmul.mubr.f32.gmra.mrb[24].mxu1 %v433_v11  ;;  %v435_v17 = vmax.f32 %v401_v14, 0.0 }
 0x12a   : > { %v434_v18 = vmax.f32 %v396_v16, 0.0  ;;  %v884_v19 = vpop.f32.mrb[12].mxu1 }
 0x12b   : > { %v411_v20 = vadd.f32 %v884_v19, %v766_v46  ;;  %v405_v21 = vpop.f32.mrb[13].mxu1 }
 0x12c   : > { %935 = vmatprep.mubr.f32.mxu1 %v434_v18  ;;  %v406_v22 = vadd.f32 %v766_v46, %v405_v21 }
 0x12d   : > { %936 = vmatmul.mubr.f32.gmra.mrb[26].mxu1 %v435_v17  ;;  %v437_v23 = vmax.f32 %v411_v20, 0.0 }
 0x12e   : > { %v436_v24 = vmax.f32 %v406_v22, 0.0  ;;  %v887_v25 = vpop.f32.mrb[14].mxu1 }
 0x12f   : > { %v421_v26 = vadd.f32 %v887_v25, %v766_v46  ;;  %v415_v27 = vpop.f32.mrb[15].mxu1 }
 0x130   : > { %938 = vmatprep.mubr.f32.mxu1 %v436_v24  ;;  %v416_v28 = vadd.f32 %v766_v46, %v415_v27 }
 0x131   : > { %939 = vmatmul.mubr.f32.gmra.mrb[28].mxu1 %v437_v23  ;;  %v439_v29 = vmax.f32 %v421_v26, 0.0  ;;  %v223_v26 = vld [vmem:[#allocation2 + $0x100] sm:$0x1] }
 0x132   : > { %v438_v30 = vmax.f32 %v416_v28, 0.0 }
 0x134   : > { %941 = vmatprep.mubr.f32.mxu1 %v438_v30 }
 0x135   : > { %942 = vmatmul.mubr.f32.gmra.mrb[30].mxu1 %v439_v29 }
 0x1ec   : > { %v922_v34 = vpop.f32.mrb[16].mxu1 }
 0x1ed   : > { %v516_v35 = vadd.f32 %v922_v34, %v783_v33  ;;  %v510_v36 = vpop.f32.mrb[17].mxu1 }
 0x1ee   : > { %v511_v37 = vadd.f32 %v783_v33, %v510_v36 }
 0x1ef   : > { %v590_v38 = vmax.f32 %v516_v35, 0.0 }
 0x1f0   : > { %v589_v39 = vmax.f32 %v511_v37, 0.0  ;;  %v925_v40 = vpop.f32.mrb[18].mxu1 }
 0x1f1   : > { %v526_v41 = vadd.f32 %v925_v40, %v783_v33  ;;  %v520_v42 = vpop.f32.mrb[19].mxu1 }
 0x1f2   : > { %v521_v43 = vadd.f32 %v783_v33, %v520_v42  ;;  %v1020_v44 = vpack.c.bf16 %v590_v38, %v589_v39 }
 0x1f3   : > { %v592_v45 = vmax.f32 %v526_v41, 0.0 }
 0x1f4   : > { %v591_v46 = vmax.f32 %v521_v43, 0.0  ;;  %1021 = vmatpush3.bf16.xpose.msra.mxu0 %v1020_v44  ;;  %v928_v47 = vpop.f32.mrb[20].mxu1 }
 0x1f5   : > { %v536_v48 = vadd.f32 %v928_v47, %v783_v33  ;;  %v530_v49 = vpop.f32.mrb[21].mxu1  ;;  %1022 = vmatprep.subr.bf16.mxu0 %v1199_v31 }
 0x1f6   : > { %v1023_v50 = vpack.c.bf16 %v592_v45, %v591_v46  ;;  %v531_v51 = vadd.f32 %v783_v33, %v530_v49 }
 0x1f7   : > { %v594_v52 = vmax.f32 %v536_v48, 0.0 }
 0x1f8   : > { %v593_v53 = vmax.f32 %v531_v51, 0.0  ;;  %v931_v54 = vpop.f32.mrb[22].mxu1 }
 0x1f9   : > { %v546_v55 = vadd.f32 %v931_v54, %v783_v33  ;;  %v540_v56 = vpop.f32.mrb[23].mxu1 }
 0x1fa   : > { %v1026_v57 = vpack.c.bf16 %v594_v52, %v593_v53  ;;  %v541_v58 = vadd.f32 %v783_v33, %v540_v56 }
 0x1fb   : > { %v596_v59 = vmax.f32 %v546_v55, 0.0 }
 0x1fc   : > { %1024 = vmatpush3.bf16.xpose.msra.mxu0 %v1023_v50  ;;  %v595_v60 = vmax.f32 %v541_v58, 0.0  ;;  %v934_v61 = vpop.f32.mrb[24].mxu1 }
 0x1fd   : > { %1025 = vmatprep.subr.bf16.mxu0 %v1199_v31  ;;  %v556_v62 = vadd.f32 %v934_v61, %v783_v33  ;;  %v550_v63 = vpop.f32.mrb[25].mxu1 }
 0x1fe   : > { %v1029_v0 = vpack.c.bf16 %v596_v59, %v595_v60  ;;  %v551_v1 = vadd.f32 %v783_v33, %v550_v63 }
 0x1ff   : > { %v598_v2 = vmax.f32 %v556_v62, 0.0 }
 0x200   : > { %v597_v3 = vmax.f32 %v551_v1, 0.0  ;;  %v937_v4 = vpop.f32.mrb[26].mxu1 }
 0x201   : > { %v566_v5 = vadd.f32 %v937_v4, %v783_v33  ;;  %v560_v6 = vpop.f32.mrb[27].mxu1 }
 0x202   : > { %v1032_v7 = vpack.c.bf16 %v598_v2, %v597_v3  ;;  %v561_v8 = vadd.f32 %v783_v33, %v560_v6 }
 0x203   : > { %v600_v9 = vmax.f32 %v566_v5, 0.0 }
 0x204   : > { %1027 = vmatpush3.bf16.xpose.msra.mxu0 %v1026_v57  ;;  %v599_v10 = vmax.f32 %v561_v8, 0.0  ;;  %v940_v11 = vpop.f32.mrb[28].mxu1 }
 0x205   : > { %1028 = vmatprep.subr.bf16.mxu0 %v1199_v31  ;;  %v576_v12 = vadd.f32 %v940_v11, %v783_v33  ;;  %v570_v13 = vpop.f32.mrb[29].mxu1 }
 0x206   : > { %v1035_v14 = vpack.c.bf16 %v600_v9, %v599_v10  ;;  %v571_v15 = vadd.f32 %v783_v33, %v570_v13 }
 0x207   : > { %v602_v16 = vmax.f32 %v576_v12, 0.0 }
 0x208   : > { %v601_v17 = vmax.f32 %v571_v15, 0.0  ;;  %v943_v18 = vpop.f32.mrb[30].mxu1 }
 0x209   : > { %v586_v19 = vadd.f32 %v943_v18, %v783_v33  ;;  %v580_v20 = vpop.f32.mrb[31].mxu1 }
 0x20a   : > { %v1038_v21 = vpack.c.bf16 %v602_v16, %v601_v17  ;;  %v581_v22 = vadd.f32 %v783_v33, %v580_v20 }
 0x20b   : > { %v604_v23 = vmax.f32 %v586_v19, 0.0 }
 0x20c   : > { %1030 = vmatpush3.bf16.xpose.msra.mxu0 %v1029_v0  ;;  %v603_v24 = vmax.f32 %v581_v22, 0.0 }
 0x20d   : > { %1031 = vmatprep.subr.bf16.mxu0 %v1199_v31 }
 0x20e   : > { %v1041_v25 = vpack.c.bf16 %v604_v23, %v603_v24 }
 0x214   : > { %1033 = vmatpush3.bf16.xpose.msra.mxu0 %v1032_v7 }
 0x215   : > { %1034 = vmatprep.subr.bf16.mxu0 %v1199_v31 }
 0x21c   : > { %1036 = vmatpush3.bf16.xpose.msra.mxu0 %v1035_v14 }
 0x21d   : > { %1037 = vmatprep.subr.bf16.mxu0 %v1199_v31 }
 0x224   : > { %1039 = vmatpush3.bf16.xpose.msra.mxu0 %v1038_v21 }
 0x225   : > { %1040 = vmatprep.subr.bf16.mxu0 %v1199_v31 }
 0x22c   : > { %1042 = vmatpush3.bf16.xpose.msra.mxu0 %v1041_v25 }
 0x233   : > { %977 = vmatmul.mubr.f32.vlgmr.msra.gmra.mrb[0].mxu0 %v223_v26 }
 0x306   : > { %v671_v27 = vpop.f32.mrb[0].mxu0 }
 0x307   : > { %1098 = vtanh.f32 %v671_v27  ;;  %v978_v28 = vpop.f32.mrb[1].mxu0 }
 0x311   : > { %v1099_v29 = vpop.eup %1098 }
 0x312   : > { %v676_v30 = vmul.f32 2.0, %v1099_v29 }
 0x314   : > { %677 = vst [vmem:[%s178_s5] sm:$0x1] %v676_v30 }
 0x315   : > { %1141 = shalt.err (!%p1138_p7)
}
 0x316   : > { %s1142_s19 = scalar_lea.hbm %s1367_s9, 16  ;;  %s1146_s26 = scalar_lea.hbm %s1412_s3, 32 }
 0x317   : > { %p1143_p8 = scmp.ne.s32.totalorder %s1367_s9, %s1142_s19  ;;  %p1147_p1 = scmp.lt.u32.totalorder %s1367_s9, %s1412_s3 }
 0x318   : > { %p1148_p0 = scmp.lt.u32.totalorder %s1146_s26, %s1142_s19  ;;  %p1150_p6 = scmp.lt.u32.totalorder %s1142_s19, %s1367_s9 }
 0x319   : > { %p1144_p11 = pnand %p1143_p8, %p1423_p9 }
 0x31a   : > { %p1149_p5 = por %p1148_p0, %p1147_p1 }
 0x31b   : > { %p1145_p13 = pneg %p1144_p11 }
 0x31c   : > { %p1151_p10 = por %p1150_p6, %p1149_p5 }
 0x31e   : > { %p1152_p12 = pnand %p1151_p10, %p1145_p13 }
 0x320   : > { %1155 = shalt.err (!%p1152_p12)
}
 0x321   : > { %1047 = dma.vmem_to_hbm [thread:$0]  (%p1423_p9), %s1369_s6, 16, %s1367_s9, %s679_s10  }
 0x322 PF: > { %p1059_p2 = scmp.ge.s32.totalorder %s1194_s15, 2  ;;  %s703_s29 = sand.u32 1, %s1182_s12  }
 0x323   : > { %p1424_p3 = scmp.ne.s32.totalorder %s1417_s23, 0  ;;  %s704_s30 = scalar_lea.sflag [#allocation4], %s703_s29 }
 0x325   : > { %p1054_p4 = pnand %p1059_p2, %p1424_p3 }
 0x327   : > { %1177 = dma.done.wait (!%p1054_p4), %s704_s30, 16  }
 0x328   : > { %1179 = vsyncadd (!%p1054_p4), %s704_s30, 4294967280  ;;  %p14_p7 = scmp.ge.s32.totalorder %s1248_s18, 4   ;;  %s1425_s12 = smov %s1186_s13 }
 0x329   : > { %s1426_s13 = smov %s1190_s14  ;;  %s1427_s14 = smov %s1259_s21 }
 0x32a   : > { %s1428_s15 = smov %s1248_s18  ;;  %16 = sbr.rel (!%p14_p7) target bundleno = 4 (0x4), region = 74 }
 0x331   :  { %708 = vsyncpa [#allocation3], 1 }
 0x332   :  { %710 = vsyncpa [#allocation3 + $0x1], 1 }
 0x333   :  { %711 = vsyncpa [#allocation4], 1 }
 0x334   :  { %713 = vsyncpa [#allocation4 + $0x1], 1 }

</bundles_post_ra>
